<compile_context>
chip_gen: v6e
topology: v6e:2x2x1
jax: 0.10.0
libtpu: 0.0.40
codegen_flags: <defaults>
</compile_context>

<pallas_src>
import jax
import jax.numpy as jnp
from jax.experimental import pallas as pl
from jax.experimental.pallas import tpu as pltpu

LANE = 128
SUBLANE = 8


def _round_up(x, m):
    return (x + m - 1) // m * m


# -------------------------------------------------------------------------
# Pallas kernel: one (row-block i, col-block k) step of  out = (A_hat@X)@W + b
# -------------------------------------------------------------------------
def _feature_decoder_kernel(adj_ref, x_ref, w_ref, b_ref, out_ref, acc_ref):
    k = pl.program_id(1)

    @pl.when(k == 0)
    def _():
        acc_ref[...] = jnp.zeros_like(acc_ref)

    # A_hat tile @ X tile: bf16 x bf16 inputs, f32 accumulation on the MXU.
    acc_ref[...] += jnp.dot(adj_ref[...], x_ref[...],
                            preferred_element_type=jnp.float32)

    @pl.when(k == pl.num_programs(1) - 1)
    def _():
        # Small f32 epilogue matmul + bias; lane-dense (128-padded) store.
        out_ref[...] = (
            jnp.dot(acc_ref[...], w_ref[...], preferred_element_type=jnp.float32)
            + b_ref[...]
        )


def feature_decoder_forward(x, adj, w, b, *, block_m=256, block_k=512):
    """h = A_hat @ x @ W + b  (PyG GCNConv; no activation in forward)."""
    n, d_in = x.shape
    d_out = w.shape[1]

    # Clamp tiles to the (128-rounded) problem size, keep (8,128) legality.
    n_lane = _round_up(n, LANE)
    block_m = min(block_m, n_lane)
    block_k = min(block_k, n_lane)

    n_pad_m = _round_up(n, block_m)      # output / A_hat row padding
    n_pad_k = _round_up(n, block_k)      # A_hat col / X row padding
    d_in_pad = _round_up(d_in, SUBLANE)
    d_out_pad = _round_up(d_out, LANE)

    # --- plain-JAX glue: pad (zero rows/cols contribute nothing) + cast ---
    adj_p = jnp.zeros((n_pad_m, n_pad_k), jnp.bfloat16).at[:n, :n].set(
        adj.astype(jnp.bfloat16))
    x_p = jnp.zeros((n_pad_k, d_in_pad), jnp.bfloat16).at[:n, :d_in].set(
        x.astype(jnp.bfloat16))
    w_p = jnp.zeros((d_in_pad, d_out_pad), jnp.float32).at[:d_in, :d_out].set(w)
    b_p = jnp.zeros((1, d_out_pad), jnp.float32).at[0, :d_out].set(b)

    gm = n_pad_m // block_m   # output row blocks   (parallel)
    gk = n_pad_k // block_k   # A_hat column blocks (reduction)

    out = pl.pallas_call(
        _feature_decoder_kernel,
        out_shape=jax.ShapeDtypeStruct((n_pad_m, d_out_pad), jnp.float32),
        grid_spec=pltpu.PrefetchScalarGridSpec(
            num_scalar_prefetch=0,
            grid=(gm, gk),
            in_specs=[
                pl.BlockSpec((block_m, block_k), lambda i, k: (i, k)),    # A_hat
                pl.BlockSpec((block_k, d_in_pad), lambda i, k: (k, 0)),   # X
                pl.BlockSpec((d_in_pad, d_out_pad), lambda i, k: (0, 0)), # W
                pl.BlockSpec((1, d_out_pad), lambda i, k: (0, 0)),        # b
            ],
            out_specs=pl.BlockSpec((block_m, d_out_pad), lambda i, k: (i, 0)),
            scratch_shapes=[pltpu.VMEM((block_m, d_in_pad), jnp.float32)],
        ),
        compiler_params=pltpu.CompilerParams(
            dimension_semantics=("parallel", "arbitrary")),
    )(adj_p, x_p, w_p, b_p)

    return out[:n, :d_out]


# -------------------------------------------------------------------------
# Glue: GCN symmetric normalization of a PyG-style edge_index
# -------------------------------------------------------------------------
def normalized_adjacency(edge_index, num_nodes):
    src, dst = edge_index
    a = jnp.zeros((num_nodes, num_nodes), jnp.float32).at[src, dst].set(1.0)
    a = a + jnp.eye(num_nodes, dtype=jnp.float32)                 # self loops
    deg = jnp.sum(a, axis=1)
    dinv = jnp.where(deg > 0, 1.0 / jnp.sqrt(deg), 0.0)
    return dinv[:, None] * a * dinv[None, :]


# -------------------------------------------------------------------------
# Main
# -------------------------------------------------------------------------
if __name__ == "__main__":
    N = 300                      # non-multiple of 128: exercises padding path
    latent_dim, output_dim = 8, 16

    root = jax.random.PRNGKey(0)
    k_w, k_x = jax.random.split(root)

    # GCNConv params: glorot weight (in, out), zero bias (PyG defaults).
    lim = (6.0 / (latent_dim + output_dim)) ** 0.5
    w = jax.random.uniform(k_w, (latent_dim, output_dim), jnp.float32, -lim, lim)
    b = jnp.zeros((output_dim,), jnp.float32)

    x = jax.random.normal(k_x, (N, latent_dim), jnp.float32)

    # deterministic ring graph, both directions (symmetric)
    idx = jnp.arange(N)
    src = jnp.concatenate([idx, (idx + 1) % N])
    dst = jnp.concatenate([(idx + 1) % N, idx])
    edge_index = jnp.stack([src, dst])
    adj = normalized_adjacency(edge_index, N)

    h = jax.block_until_ready(feature_decoder_forward(x, adj, w, b))

    # Pure-JAX references: exact bf16-matched and full-f32 (loose tolerance
    # covers the intentional bf16 cast of A_hat / X).
    adj_bf = adj.astype(jnp.bfloat16).astype(jnp.float32)
    x_bf = x.astype(jnp.bfloat16).astype(jnp.float32)
    ref_bf = (adj_bf @ x_bf) @ w + b
    ref_f32 = adj @ (x @ w) + b

    assert h.shape == (N, output_dim)
    assert bool(jnp.all(jnp.isfinite(h)))
    assert float(jnp.max(jnp.abs(h - ref_bf))) < 1e-2
    assert float(jnp.max(jnp.abs(h - ref_f32))) < 0.2
    print("KERNEL_OK")
</pallas_src>

<mosaic_0001>
module attributes {stable_mosaic.version = 11 : i64} {
  func.func @_feature_decoder_kernel(%arg0: i32, %arg1: i32, %arg2: memref<256x384xbf16, #tpu.memory_space<vmem>>, %arg3: memref<384x8xbf16, #tpu.memory_space<vmem>>, %arg4: memref<8x128xf32, #tpu.memory_space<vmem>>, %arg5: memref<1x128xf32, #tpu.memory_space<vmem>>, %arg6: memref<256x128xf32, #tpu.memory_space<vmem>>, %arg7: memref<256x8xf32, #tpu.memory_space<vmem>>) attributes {dimension_semantics = [#tpu.dimension_semantics<parallel>, #tpu.dimension_semantics<arbitrary>], iteration_bounds = array<i64: 2, 1>, scalar_prefetch = 0 : i64, scratch_operands = 1 : i64, tpu.core_type = #tpu.core_type<tc>, window_params = [{transform_indices = @transform_0, window_bounds = array<i64: 256, 384>}, {transform_indices = @transform_1, window_bounds = array<i64: 384, 8>}, {pipeline_mode = #tpu.pipeline_mode<synchronous>, transform_indices = @transform_2, window_bounds = array<i64: 8, 128>}, {pipeline_mode = #tpu.pipeline_mode<synchronous>, transform_indices = @transform_3, window_bounds = array<i64: 1, 128>}, {transform_indices = @transform_4, window_bounds = array<i64: 256, 128>}]} {
    %c0_i32 = arith.constant 0 : i32
    %0 = arith.cmpi eq, %arg1, %c0_i32 : i32
    %1 = arith.extui %0 : i1 to i32
    %c0_i32_0 = arith.constant 0 : i32
    %2 = arith.cmpi ne, %1, %c0_i32_0 : i32
    scf.if %2 {
      %cst_10 = arith.constant 0.000000e+00 : f32
      %12 = vector.broadcast %cst_10 : f32 to vector<256x8xf32>
      %c0_11 = arith.constant 0 : index
      %c0_12 = arith.constant 0 : index
      %13 = vector.load %arg7[%c0_11, %c0_12] : memref<256x8xf32, #tpu.memory_space<vmem>>, vector<256x8xf32>
      tpu.vector_store %arg7[%c0_11, %c0_12], %12 {strides = array<i32>} : memref<256x8xf32, #tpu.memory_space<vmem>>, vector<256x8xf32>,
    } else {
    }
    %c0 = arith.constant 0 : index
    %c0_1 = arith.constant 0 : index
    %3 = vector.load %arg7[%c0, %c0_1] : memref<256x8xf32, #tpu.memory_space<vmem>>, vector<256x8xf32>
    %c0_2 = arith.constant 0 : index
    %c0_3 = arith.constant 0 : index
    %4 = vector.load %arg2[%c0_2, %c0_3] : memref<256x384xbf16, #tpu.memory_space<vmem>>, vector<256x384xbf16>
    %c0_4 = arith.constant 0 : index
    %c0_5 = arith.constant 0 : index
    %5 = vector.load %arg3[%c0_4, %c0_5] : memref<384x8xbf16, #tpu.memory_space<vmem>>, vector<384x8xbf16>
    %cst = arith.constant dense<0.000000e+00> : vector<256x8xf32>
    %6 = tpu.matmul %4, %5, %cst {dimension_numbers = #tpu.dot_dimension_numbers<[1], [0], [0], [1], [0, 0, 1, 1], [], []>} : vector<256x384xbf16>, vector<384x8xbf16>, vector<256x8xf32> -> vector<256x8xf32>
    %7 = arith.addf %3, %6 : vector<256x8xf32>
    %c0_6 = arith.constant 0 : index
    %c0_7 = arith.constant 0 : index
    %8 = vector.load %arg7[%c0_6, %c0_7] : memref<256x8xf32, #tpu.memory_space<vmem>>, vector<256x8xf32>
    tpu.vector_store %arg7[%c0_6, %c0_7], %7 {strides = array<i32>} : memref<256x8xf32, #tpu.memory_space<vmem>>, vector<256x8xf32>,
    %c0_i32_8 = arith.constant 0 : i32
    %9 = arith.cmpi eq, %arg1, %c0_i32_8 : i32
    %10 = arith.extui %9 : i1 to i32
    %c0_i32_9 = arith.constant 0 : i32
    %11 = arith.cmpi ne, %10, %c0_i32_9 : i32
    scf.if %11 {
      %c0_10 = arith.constant 0 : index
      %c0_11 = arith.constant 0 : index
      %12 = vector.load %arg7[%c0_10, %c0_11] : memref<256x8xf32, #tpu.memory_space<vmem>>, vector<256x8xf32>
      %c0_12 = arith.constant 0 : index
      %c0_13 = arith.constant 0 : index
      %13 = vector.load %arg4[%c0_12, %c0_13] : memref<8x128xf32, #tpu.memory_space<vmem>>, vector<8x128xf32>
      %cst_14 = arith.constant dense<0.000000e+00> : vector<256x128xf32>
      %14 = tpu.matmul %12, %13, %cst_14 {dimension_numbers = #tpu.dot_dimension_numbers<[1], [0], [0], [1], [0, 0, 1, 1], [], []>} : vector<256x8xf32>, vector<8x128xf32>, vector<256x128xf32> -> vector<256x128xf32>
      %c0_15 = arith.constant 0 : index
      %c0_16 = arith.constant 0 : index
      %15 = vector.load %arg5[%c0_15, %c0_16] : memref<1x128xf32, #tpu.memory_space<vmem>>, vector<1x128xf32>
      %16 = vector.broadcast %15 : vector<1x128xf32> to vector<256x128xf32>
      %17 = arith.addf %14, %16 : vector<256x128xf32>
      %c0_17 = arith.constant 0 : index
      %c0_18 = arith.constant 0 : index
      %18 = vector.load %arg6[%c0_17, %c0_18] : memref<256x128xf32, #tpu.memory_space<vmem>>, vector<256x128xf32>
      tpu.vector_store %arg6[%c0_17, %c0_18], %17 {strides = array<i32>} : memref<256x128xf32, #tpu.memory_space<vmem>>, vector<256x128xf32>,
    } else {
    }
    return
  }
  func.func @transform_0(%arg0: i32, %arg1: i32) -> (i32, i32) {
    %c0_i32 = arith.constant 0 : i32
    return %arg0, %arg1 : i32, i32
  }
  func.func @transform_1(%arg0: i32, %arg1: i32) -> (i32, i32) {
    %c0_i32 = arith.constant 0 : i32
    %c0_i32_0 = arith.constant 0 : i32
    return %arg1, %c0_i32 : i32, i32
  }
  func.func @transform_2(%arg0: i32, %arg1: i32) -> (i32, i32) {
    %c0_i32 = arith.constant 0 : i32
    %c0_i32_0 = arith.constant 0 : i32
    %c0_i32_1 = arith.constant 0 : i32
    return %c0_i32, %c0_i32_0 : i32, i32
  }
  func.func @transform_3(%arg0: i32, %arg1: i32) -> (i32, i32) {
    %c0_i32 = arith.constant 0 : i32
    %c0_i32_0 = arith.constant 0 : i32
    %c0_i32_1 = arith.constant 0 : i32
    return %c0_i32, %c0_i32_0 : i32, i32
  }
  func.func @transform_4(%arg0: i32, %arg1: i32) -> (i32, i32) {
    %c0_i32 = arith.constant 0 : i32
    %c0_i32_0 = arith.constant 0 : i32
    return %arg0, %c0_i32 : i32, i32
  }
}

</mosaic_0001>

<bundles_post_ra>
// kernel: tpu_custom_call.1
= control target key start
LH: loop header
LB: loop body
LE: loop exit
PB: predicated region body
PF: predicated region fallthrough
CT: control target
= control target key end

     0   :  { %9 = vsyncpa [#allocation4], 0  ;;  %s2864_s0 = inlined_call_operand.hbm [shape: bf16[512,384], index: 0, kind: input, shape index: {}]   ;;  %s2865_s1 = inlined_call_operand.vmem [shape: bf16[384,8], index: 1, kind: input, shape index: {}]   ;;  %s2866_s2 = inlined_call_operand.vmem [shape: f32[8,128], index: 2, kind: input, shape index: {}]   ;;  %s2867_s3 = inlined_call_operand.vmem [shape: f32[1,128], index: 3, kind: input, shape index: {}]   ;;  %s2868_s4 = inlined_call_operand.hbm [shape: f32[512,128], index: 4, kind: output, shape index: {}]  }
   0x1   :  { %11 = vsyncpa [#allocation4 + $0x1], 0 }
   0x2   :  { %12 = vsyncpa [#allocation5], 0 }
   0x3   :  { %14 = vsyncpa [#allocation5 + $0x1], 0  ;;  %s2424_s15 = smov 0   ;;  %s2426_s16 = smov 0  }
   0x4   :  { %s2428_s17 = smov 0   ;;  %s2430_s18 = smov 0  }
   0x5   :  { %s2432_s19 = smov 0   ;;  %s2434_s20 = smov 0  }
   0x6 LB: > { %s1736_s21 = sadd.s32 4294967295, %s2390_s20   ;;  %s1737_s22 = sadd.s32 4294967294, %s2390_s20   ;;  %s2390_s20 = sphi %s2434_s20, %s20_s20   ;;  %s2386_s19 = sphi %s2432_s19, %s2879_s19   ;;  %s2382_s18 = sphi %s2430_s18, %s2878_s18   ;;  %s2378_s17 = sphi %s2428_s17, %s2877_s17   ;;  %s2374_s16 = sphi %s2426_s16, %s2876_s16   ;;  %s2370_s15 = sphi %s2424_s15, %s2875_s15  }
   0x7   : > { %s32_s23 = sadd.s32 1, %s2386_s19  ;;  %s41_s24 = sadd.s32 1, %s2378_s17 }
   0x8   : > { %p34_p0 = scmp.ge.s32.totalorder %s32_s23, 2  ;;  %p48_p1 = scmp.ne.s32.totalorder %s2378_s17, %s2374_s16 }
   0x9   : > { %p49_p2 = scmp.eq.s32.totalorder %s2390_s20, 0  ;;  %p54_p3 = scmp.ne.s32.totalorder %s2374_s16, %s2370_s15 }
   0xa   : > { %s2881_s23 = smov (%p34_p0, %s32_s23), 0  ;;  %p55_p5 = scmp.eq.s32.totalorder %s1736_s21, 0 }
   0xb   : > { %p2465_p4 = por %p49_p2, %p48_p1  ;;  %s36_s26 = ssub.s32 %s2386_s19, %s2881_s23 }
   0xc   : > { %p146_p6 = scmp.eq.s32.totalorder %s1736_s21, 1  ;;  %p39_p7 = scmp.eq.s32.totalorder %s36_s26, 0 }
   0xd   : > { %p2471_p8 = por %p55_p5, %p54_p3  ;;  %p152_p10 = scmp.eq.s32.totalorder %s1737_s22, 1 }
   0xe   : > { %p2475_p9 = por %p146_p6, %p48_p1  ;;  %p2139_p13 = scmp.lt.s32.totalorder %s2390_s20, 2 }
   0xf   : > { %s2480_s29 = scalar_select %p39_p7, %s2378_s17, %s41_s24  }
  0x10   : > { %p2482_p11 = por %p152_p10, %p54_p3  ;;  %s187_s5 = sand.u32 1, %s2378_s17  }
  0x11   : > { %s2124_s6 = smul.u32 384, %s187_s5  ;;  %p2492_p0 = pnand %p2139_p13, %p2465_p4 }
  0x12   : > { %s2125_s7 = smul.u32 6144, %s2386_s19  ;;  %p1744_p1 = scmp.ge.s32.totalorder %s2390_s20, 1 }
  0x13   : > { %s191_s12 = scalar_lea.vmem [#allocation3], %s2124_s6  ;;  %s188_s14 = scalar_lea.sflag [#allocation4], %s187_s5 }
  0x14   : > { %s200_s11 = scalar_lea.hbm %s2864_s0, %s2125_s7  ;;  %s201_s13 = sshll.u32 %s191_s12, 4  ;;  %s202_s13 = int_to_ptr.vmem [resolvable:$true] %s201_s13 }
  0x15   : > { %p2284_p2 = pneg %p2492_p0  ;;  %s2295_s21 = scalar_lea.vmem %s202_s13, 6144 }
  0x16   : > { %p2296_p3 = scmp.ne.s32.totalorder %s202_s13, %s2295_s21  ;;  %s2392_s22 = smov [#allocation3]  }
  0x17   : > { %s2300_s24 = sshll.u32 %s2392_s22, 4  ;;  %s2301_s24 = int_to_ptr.vmem [resolvable:$false] %s2300_s24 }
  0x18   : > { %p2298_p5 = pnand %p2296_p3, %p2284_p2  ;;  %s2302_s25 = scalar_lea.vmem %s2301_s24, 12288 }
  0x19   : > { %p2303_p4 = scmp.lt.s32.totalorder %s202_s13, %s2301_s24  ;;  %p2304_p7 = scmp.lt.s32.totalorder %s2302_s25, %s2295_s21 }
  0x1a   : > { %p2299_p6 = pneg %p2298_p5 }
  0x1b   : > { %p2305_p10 = por %p2304_p7, %p2303_p4 }
  0x1d   : > { %p2306_p13 = pnand %p2305_p10, %p2299_p6 }
  0x1f   : > { %2309 = shalt.err (!%p2306_p13)
}
  0x20   : > { %s2393_s26 = smov 192   ;;  %s2394_s5 = smov 12  }
  0x21   : > { %2134 = dma.hbm_to_vmem [thread:$0]  (!%p2492_p0), %s200_s11, 6144, %s202_s13, %s188_s14, %s2393_s26, %s2393_s26, %s2394_s5  }
  0x22   : > { %p209_p12 = scmp.lt.s32.totalorder %s2390_s20, 3 }
  0x24   : > { %p210_p2 = pnand %p1744_p1, %p209_p12 }
  0x25   : > { %s2508_s6 = sand.u32 (!%p210_p2), 1, %s2374_s16  }
  0x26   : > { %213 = sbr.rel (%p210_p2) target bundleno = 621 (0x26d), region = 36  ;;  %s216_s9 = scalar_lea.sflag (!%p210_p2), [#allocation4], %s2508_s6 }
  0x27   : > { %s2126_s7 = smul.u32 (!%p210_p2), 384, %s2508_s6 }
  0x29   : > { %s2512_s10 = scalar_lea.vmem (!%p210_p2), [#allocation3], %s2126_s7 }
  0x2b   : > { %2361 = dma.done.wait (%p2471_p8), %s216_s9, 6144  }
  0x2c   : > { %2363 = vsyncadd (%p2471_p8), %s216_s9, 4294961152  ;;  %v2194_v0 = vld [vmem:[%s2865_s1 + $0x78] sm:$0xff]   ;;  %v2197_v3 = vld [vmem:[%s2865_s1 + $0x70] sm:$0xff]   ;;  %vm263_vm0 = vcmask 64512   ;;  %v2395_v59 = vmov 0.0   ;;  %s1856_s5 = sshll.u32 %s2382_s18, 12 }
  0x2d   : > { %v2195_v1 = vld [vmem:[%s2865_s1 + $0x38] sm:$0xff]   ;;  %1857 = vmatprep.subr.bf16.mxu0 %v2194_v0  ;;  %v2198_v4 = vld [vmem:[%s2865_s1 + $0x30] sm:$0xff]   ;;  %v2200_v6 = vld [vmem:[%s2865_s1 + $0x68] sm:$0xff]   ;;  %264 = vst.msk [vmem:[#allocation2] sm:$0xff] %vm263_vm0, %v2395_v59  ;;  %s2811_s11 = scalar_lea.hbm %s2868_s4, %s1856_s5  ;;  %s1624_s18 = scalar_lea.sflag [#allocation5], %s2508_s6 }
  0x2e   : > { %v2196_v2 = vld [vmem:[%s2865_s1 + $0xb8] sm:$0xff]   ;;  %1858 = vmatpush3.bf16.msra.mxu0 %v2195_v1  ;;  %v2199_v5 = vld [vmem:[%s2865_s1 + $0xb0] sm:$0xff]   ;;  %v2201_v7 = vld [vmem:[%s2865_s1 + $0x28] sm:$0xff]   ;;  %265 = vst.msk [vmem:[#allocation2 + $0x8] sm:$0xff] %vm263_vm0, %v2395_v59  ;;  %s2396_s13 = smov [#allocation6]  }
  0x2f   : > { %2026 = vmatprep.subr.bf16.mxu1 %v2196_v2  ;;  %1859 = vmatprep.subr.bf16.mxu0 %v2197_v3  ;;  %v2202_v8 = vld [vmem:[%s2865_s1 + $0xa8] sm:$0xff]   ;;  %v2203_v9 = vld [vmem:[%s2865_s1 + $0x60] sm:$0xff]   ;;  %v2206_v12 = vld [vmem:[%s2865_s1 + $0x58] sm:$0xff]   ;;  %266 = vst.msk [vmem:[#allocation2 + $0x10] sm:$0xff] %vm263_vm0, %v2395_v59  ;;  %s2314_s14 = sshll.u32 %s2396_s13, 4  ;;  %s2315_s14 = int_to_ptr.vmem [resolvable:$false] %s2314_s14 }
  0x30   : > { %2027 = vmatpush3.bf16.msra.mxu1 %v2196_v2  ;;  %v2204_v10 = vld [vmem:[%s2865_s1 + $0x20] sm:$0xff]   ;;  %v2208_v13 = vld [vmem:[%s2865_s1 + $0x98] sm:$0xff]   ;;  %v2209_v15 = vld [vmem:[%s2865_s1 + $0x50] sm:$0xff]   ;;  %267 = vst.msk [vmem:[#allocation2 + $0x18] sm:$0xff] %vm263_vm0, %v2395_v59  ;;  %s2316_s21 = scalar_lea.vmem %s2315_s14, 8192 }
  0x31   : > { %2028 = vmatprep.subr.bf16.mxu1 %v2199_v5  ;;  %v2205_v11 = vld [vmem:[%s2865_s1 + $0xa0] sm:$0xff]   ;;  %v2207_v14 = vld [vmem:[%s2865_s1 + $0x18] sm:$0xff]   ;;  %v2211_v16 = vld [vmem:[%s2865_s1 + $0x90] sm:$0xff]   ;;  %268 = vst.msk [vmem:[#allocation2 + $0x20] sm:$0xff] %vm263_vm0, %v2395_v59 }
  0x32   : > { %1860 = vmatpush3.bf16.msra.mxu0 %v2198_v4  ;;  %v2210_v17 = vld [vmem:[%s2865_s1 + $0x10] sm:$0xff]   ;;  %v2212_v18 = vld [vmem:[%s2865_s1 + $0x48] sm:$0xff]   ;;  %v2215_v21 = vld [vmem:[%s2865_s1 + $0x40] sm:$0xff]   ;;  %269 = vst.msk [vmem:[#allocation2 + $0x28] sm:$0xff] %vm263_vm0, %v2395_v59 }
  0x33   : > { %1861 = vmatprep.subr.bf16.mxu0 %v2200_v6  ;;  %v2213_v19 = vld [vmem:[%s2865_s1 + $0x8] sm:$0xff]   ;;  %v2217_v22 = vld [vmem:[%s2865_s1 + $0x80] sm:$0xff]   ;;  %v2230_v32 = vld [vmem:[%s2512_s10 + $0x50] ss:$12 sps:$4 sm:$0xff]   ;;  %270 = vst.msk [vmem:[#allocation2 + $0x30] sm:$0xff] %vm263_vm0, %v2395_v59 }
  0x34   : > { %2029 = vmatpush3.bf16.msra.mxu1 %v2199_v5  ;;  %v2214_v20 = vld [vmem:[%s2865_s1 + $0x88] sm:$0xff]   ;;  %v2220_v23 = vld [vmem:[%s2512_s10 + $0x4] ss:$12 sps:$4 sm:$0xff]   ;;  %v2226_v31 = vld [vmem:[%s2512_s10 + $0x34] ss:$12 sps:$4 sm:$0xff]   ;;  %271 = vst.msk [vmem:[#allocation2 + $0x38] sm:$0xff] %vm263_vm0, %v2395_v59 }
  0x35   : > { %2030 = vmatprep.subr.bf16.mxu1 %v2202_v8  ;;  %v2221_v24 = vld [vmem:[%s2512_s10 + $0x8] ss:$12 sps:$4 sm:$0xff]   ;;  %v2216_v25 = vld [vmem:[%s2865_s1] sm:$0xff]   ;;  %872 = vmatprep.mubr.bf16.mxu0 %v2220_v23  ;;  %v2228_v34 = vld [vmem:[%s2512_s10 + $0x30] ss:$12 sps:$4 sm:$0xff]   ;;  %272 = vst.msk [vmem:[#allocation2 + $0x40] sm:$0xff] %vm263_vm0, %v2395_v59 }
  0x36   : > { %1862 = vmatpush3.bf16.msra.mxu0 %v2201_v7  ;;  %2042 = vmatprep.mubr.bf16.mxu1 %v2221_v24  ;;  %v2218_v26 = vld [vmem:[%s2512_s10] ss:$12 sps:$4 sm:$0xff]   ;;  %v2223_v27 = vld [vmem:[%s2512_s10 + $0x1c] ss:$12 sps:$4 sm:$0xff]   ;;  %v2229_v29 = vld [vmem:[%s2512_s10 + $0x38] ss:$12 sps:$4 sm:$0xff]  }
  0x37   : > { %1863 = vmatprep.subr.bf16.mxu0 %v2203_v9  ;;  %v2222_v28 = vld [vmem:[%s2512_s10 + $0x20] ss:$12 sps:$4 sm:$0xff]   ;;  %v2225_v30 = vld [vmem:[%s2512_s10 + $0x18] ss:$12 sps:$4 sm:$0xff]   ;;  %v2237_v33 = vld [vmem:[%s2512_s10 + $0x68] ss:$12 sps:$4 sm:$0xff]  }
  0x38   : > { %2031 = vmatpush3.bf16.msra.mxu1 %v2202_v8  ;;  %v2231_v35 = vld [vmem:[%s2512_s10 + $0x4c] ss:$12 sps:$4 sm:$0xff]   ;;  %v2233_v38 = vld [vmem:[%s2512_s10 + $0x48] ss:$12 sps:$4 sm:$0xff]   ;;  %v2234_v39 = vld [vmem:[%s2512_s10 + $0x64] ss:$12 sps:$4 sm:$0xff]  }
  0x39   : > { %2032 = vmatprep.subr.bf16.mxu1 %v2205_v11  ;;  %v2238_v36 = vld [vmem:[%s2512_s10 + $0x80] ss:$12 sps:$4 sm:$0xff]   ;;  %v2245_v37 = vld [vmem:[%s2512_s10 + $0x98] ss:$12 sps:$4 sm:$0xff]   ;;  %v2246_v40 = vld [vmem:[%s2512_s10 + $0xb0] ss:$12 sps:$4 sm:$0xff]  }
  0x3a   : > { %1864 = vmatpush3.bf16.msra.mxu0 %v2204_v10  ;;  %v2253_v41 = vld [vmem:[%s2512_s10 + $0xc8] ss:$12 sps:$4 sm:$0xff]   ;;  %v2236_v42 = vld [vmem:[%s2512_s10 + $0x60] ss:$12 sps:$4 sm:$0xff]   ;;  %v2261_v45 = vld [vmem:[%s2512_s10 + $0xf8] ss:$12 sps:$4 sm:$0xff]  }
  0x3b   : > { %1865 = vmatprep.subr.bf16.mxu0 %v2206_v12  ;;  %v2239_v43 = vld [vmem:[%s2512_s10 + $0x7c] ss:$12 sps:$4 sm:$0xff]   ;;  %v2254_v44 = vld [vmem:[%s2512_s10 + $0xe0] ss:$12 sps:$4 sm:$0xff]   ;;  %v2241_v46 = vld [vmem:[%s2512_s10 + $0x78] ss:$12 sps:$4 sm:$0xff]  }
  0x3c   : > { %2033 = vmatpush3.bf16.msra.mxu1 %v2205_v11  ;;  %v2242_v47 = vld [vmem:[%s2512_s10 + $0x94] ss:$12 sps:$4 sm:$0xff]   ;;  %v2262_v48 = vld [vmem:[%s2512_s10 + $0x110] ss:$12 sps:$4 sm:$0xff]   ;;  %v2247_v51 = vld [vmem:[%s2512_s10 + $0xac] ss:$12 sps:$4 sm:$0xff]  }
  0x3d   : > { %2034 = vmatprep.subr.bf16.mxu1 %v2208_v13  ;;  %v2269_v49 = vld [vmem:[%s2512_s10 + $0x128] ss:$12 sps:$4 sm:$0xff]   ;;  %v2244_v50 = vld [vmem:[%s2512_s10 + $0x90] ss:$12 sps:$4 sm:$0xff]   ;;  %v2270_v52 = vld [vmem:[%s2512_s10 + $0x140] ss:$12 sps:$4 sm:$0xff]  }
  0x3e   : > { %1866 = vmatpush3.bf16.msra.mxu0 %v2207_v14  ;;  %v2276_v53 = vld [vmem:[%s2512_s10 + $0x158] ss:$12 sps:$4 sm:$0xff]   ;;  %v2249_v54 = vld [vmem:[%s2512_s10 + $0xa8] ss:$12 sps:$4 sm:$0xff]   ;;  %v2278_v56 = vld [vmem:[%s2512_s10 + $0x170] ss:$12 sps:$4 sm:$0xff]  }
  0x3f   : > { %1867 = vmatprep.subr.bf16.mxu0 %v2209_v15  ;;  %v2250_v55 = vld [vmem:[%s2512_s10 + $0xc4] ss:$12 sps:$4 sm:$0xff]   ;;  %v2252_v57 = vld [vmem:[%s2512_s10 + $0xc0] ss:$12 sps:$4 sm:$0xff]   ;;  %v2255_v58 = vld [vmem:[%s2512_s10 + $0xdc] ss:$12 sps:$4 sm:$0xff]  }
  0x40   : > { %2035 = vmatpush3.bf16.msra.mxu1 %v2208_v13  ;;  %273 = vst.msk [vmem:[#allocation2 + $0x48] sm:$0xff] %vm263_vm0, %v2395_v59  ;;  %274 = vst.msk [vmem:[#allocation2 + $0x50] sm:$0xff] %vm263_vm0, %v2395_v59  ;;  %v2257_v60 = vld [vmem:[%s2512_s10 + $0xd8] ss:$12 sps:$4 sm:$0xff]   ;;  %v2258_v61 = vld [vmem:[%s2512_s10 + $0xf4] ss:$12 sps:$4 sm:$0xff]  }
  0x41   : > { %2036 = vmatprep.subr.bf16.mxu1 %v2211_v16  ;;  %275 = vst.msk [vmem:[#allocation2 + $0x58] sm:$0xff] %vm263_vm0, %v2395_v59  ;;  %276 = vst.msk [vmem:[#allocation2 + $0x60] sm:$0xff] %vm263_vm0, %v2395_v59  ;;  %v2260_v62 = vld [vmem:[%s2512_s10 + $0xf0] ss:$12 sps:$4 sm:$0xff]   ;;  %v2263_v63 = vld [vmem:[%s2512_s10 + $0x10c] ss:$12 sps:$4 sm:$0xff]  }
  0x42   : > { %1868 = vmatpush3.bf16.msra.mxu0 %v2210_v17  ;;  %277 = vst.msk [vmem:[#allocation2 + $0x68] sm:$0xff] %vm263_vm0, %v2395_v59  ;;  %278 = vst.msk [vmem:[#allocation2 + $0x70] sm:$0xff] %vm263_vm0, %v2395_v59  ;;  %v1262_v0 = vld [vmem:[%s2866_s2] sm:$0xff]  ;;  %v2265_v1 = vld [vmem:[%s2512_s10 + $0x108] ss:$12 sps:$4 sm:$0xff]  }
  0x43   : > { %1869 = vmatprep.subr.bf16.mxu0 %v2212_v18  ;;  %279 = vst.msk [vmem:[#allocation2 + $0x78] sm:$0xff] %vm263_vm0, %v2395_v59  ;;  %280 = vst.msk [vmem:[#allocation2 + $0x80] sm:$0xff] %vm263_vm0, %v2395_v59  ;;  %v2266_v2 = vld [vmem:[%s2512_s10 + $0x124] ss:$12 sps:$4 sm:$0xff]   ;;  %v2268_v3 = vld [vmem:[%s2512_s10 + $0x120] ss:$12 sps:$4 sm:$0xff]  }
  0x44   : > { %2037 = vmatpush3.bf16.msra.mxu1 %v2211_v16  ;;  %281 = vst.msk [vmem:[#allocation2 + $0x88] sm:$0xff] %vm263_vm0, %v2395_v59  ;;  %282 = vst.msk [vmem:[#allocation2 + $0x90] sm:$0xff] %vm263_vm0, %v2395_v59  ;;  %v2271_v4 = vld [vmem:[%s2512_s10 + $0x13c] ss:$12 sps:$4 sm:$0xff]   ;;  %v2273_v5 = vld [vmem:[%s2512_s10 + $0x138] ss:$12 sps:$4 sm:$0xff]  }
  0x45   : > { %2038 = vmatprep.subr.bf16.mxu1 %v2214_v20  ;;  %283 = vst.msk [vmem:[#allocation2 + $0x98] sm:$0xff] %vm263_vm0, %v2395_v59  ;;  %284 = vst.msk [vmem:[#allocation2 + $0xa0] sm:$0xff] %vm263_vm0, %v2395_v59  ;;  %v2274_v6 = vld [vmem:[%s2512_s10 + $0x154] ss:$12 sps:$4 sm:$0xff]   ;;  %v2277_v7 = vld [vmem:[%s2512_s10 + $0x150] ss:$12 sps:$4 sm:$0xff]  }
  0x46   : > { %1870 = vmatpush3.bf16.msra.mxu0 %v2213_v19  ;;  %285 = vst.msk [vmem:[#allocation2 + $0xa8] sm:$0xff] %vm263_vm0, %v2395_v59  ;;  %286 = vst.msk [vmem:[#allocation2 + $0xb0] sm:$0xff] %vm263_vm0, %v2395_v59  ;;  %v2279_v8 = vld [vmem:[%s2512_s10 + $0x16c] ss:$12 sps:$4 sm:$0xff]   ;;  %v2281_v9 = vld [vmem:[%s2512_s10 + $0x168] ss:$12 sps:$4 sm:$0xff]  }
  0x47   : > { %1871 = vmatprep.subr.bf16.mxu0 %v2215_v21  ;;  %287 = vst.msk [vmem:[#allocation2 + $0xb8] sm:$0xff] %vm263_vm0, %v2395_v59  ;;  %288 = vst.msk [vmem:[#allocation2 + $0xc0] sm:$0xff] %vm263_vm0, %v2395_v59  ;;  %v296_v15 = vld [vmem:[#allocation2] sm:$0xff]  ;;  %v297_v23 = vld [vmem:[#allocation2 + $0x8] sm:$0xff]  ;;  %s1745_s10 = sshll.u32 %s2508_s6, 8 }
  0x48   : > { %2039 = vmatpush3.bf16.msra.mxu1 %v2214_v20  ;;  %289 = vst.msk [vmem:[#allocation2 + $0xc8] sm:$0xff] %vm263_vm0, %v2395_v59  ;;  %290 = vst.msk [vmem:[#allocation2 + $0xd0] sm:$0xff] %vm263_vm0, %v2395_v59  ;;  %s2744_s26 = scalar_lea.vmem [#allocation6], %s1745_s10 }
  0x49   : > { %2040 = vmatprep.subr.bf16.mxu1 %v2217_v22  ;;  %291 = vst.msk [vmem:[#allocation2 + $0xd8] sm:$0xff] %vm263_vm0, %v2395_v59  ;;  %292 = vst.msk [vmem:[#allocation2 + $0xe0] sm:$0xff] %vm263_vm0, %v2395_v59  ;;  %s1637_s7 = sshll.u32 %s2744_s26, 4  ;;  %s2813_s7 = int_to_ptr.vmem [resolvable:$true] %s1637_s7 }
  0x4a   : > { %1872 = vmatpush3.bf16.msra.mxu0 %v2216_v25  ;;  %293 = vst.msk [vmem:[#allocation2 + $0xe8] sm:$0xff] %vm263_vm0, %v2395_v59  ;;  %294 = vst.msk [vmem:[#allocation2 + $0xf0] sm:$0xff] %vm263_vm0, %v2395_v59  ;;  %s2310_s12 = scalar_lea.vmem %s2813_s7, 4096  ;;  %p2317_p1 = scmp.lt.s32.totalorder %s2813_s7, %s2315_s14 }
  0x4b   : > { %295 = vst.msk [vmem:[#allocation2 + $0xf8] sm:$0xff] %vm263_vm0, %v2395_v59  ;;  %p2311_p8 = scmp.ne.s32.totalorder %s2813_s7, %s2310_s12  ;;  %p2318_p3 = scmp.lt.s32.totalorder %s2316_s21, %s2310_s12 }
  0x4c   : > { %2041 = vmatpush3.bf16.msra.mxu1 %v2217_v22 }
  0x4d   : > { %873 = vmatmul.mubr.bf16.vlgmr.msra.gmra.mxu0 %v2218_v26  ;;  %2074 = vmatprep.subr.mxu1 %v1262_v0  ;;  %p2312_p12 = pnand %p2311_p8, %p2475_p9  ;;  %p2319_p5 = por %p2318_p3, %p2317_p1 }
  0x4e   : > { %880 = vmatprep.mubr.bf16.mxu0 %v2223_v27 }
  0x4f   : > { %2043 = vmatmul.mubr.bf16.vlgmr.msra.gmra.mxu1 %v2222_v28  ;;  %p2313_p0 = pneg %p2312_p12 }
  0x50   : > { %2046 = vmatprep.mubr.bf16.mxu1 %v2229_v29  ;;  %2075 = vmatpush3.msra.mxu1 %v1262_v0 }
  0x51   : > { %p2320_p6 = pnand %p2319_p5, %p2313_p0 }
  0x55   : > { %881 = vmatmul.mubr.bf16.gmra.mxu0 %v2225_v30  ;;  %v298_v30 = vld [vmem:[#allocation2 + $0x10] sm:$0xff] }
  0x56   : > { %888 = vmatprep.mubr.bf16.mxu0 %v2226_v31 }
  0x57   : > { %2047 = vmatmul.mubr.bf16.gmra.mxu1 %v2230_v32 }
  0x58   : > { %2050 = vmatprep.mubr.bf16.mxu1 %v2237_v33 }
  0x5d   : > { %889 = vmatmul.mubr.bf16.gmra.mxu0 %v2228_v34 }
  0x5e   : > { %896 = vmatprep.mubr.bf16.mxu0 %v2231_v35 }
  0x5f   : > { %2051 = vmatmul.mubr.bf16.gmra.mxu1 %v2238_v36 }
  0x60   : > { %2054 = vmatprep.mubr.bf16.mxu1 %v2245_v37  ;;  %v299_v37 = vld [vmem:[#allocation2 + $0x18] sm:$0xff] }
  0x65   : > { %897 = vmatmul.mubr.bf16.gmra.mxu0 %v2233_v38 }
  0x66   : > { %904 = vmatprep.mubr.bf16.mxu0 %v2234_v39 }
  0x67   : > { %2055 = vmatmul.mubr.bf16.gmra.mxu1 %v2246_v40 }
  0x68   : > { %2058 = vmatprep.mubr.bf16.mxu1 %v2253_v41 }
  0x6d   : > { %905 = vmatmul.mubr.bf16.gmra.mxu0 %v2236_v42 }
  0x6e   : > { %912 = vmatprep.mubr.bf16.mxu0 %v2239_v43 }
  0x6f   : > { %2059 = vmatmul.mubr.bf16.gmra.mxu1 %v2254_v44 }
  0x70   : > { %2062 = vmatprep.mubr.bf16.mxu1 %v2261_v45 }
  0x75   : > { %913 = vmatmul.mubr.bf16.gmra.mxu0 %v2241_v46  ;;  %v300_v46 = vld [vmem:[#allocation2 + $0x20] sm:$0xff] }
  0x76   : > { %920 = vmatprep.mubr.bf16.mxu0 %v2242_v47 }
  0x77   : > { %2063 = vmatmul.mubr.bf16.gmra.mxu1 %v2262_v48 }
  0x78   : > { %2066 = vmatprep.mubr.bf16.mxu1 %v2269_v49 }
  0x7d   : > { %921 = vmatmul.mubr.bf16.gmra.mxu0 %v2244_v50 }
  0x7e   : > { %928 = vmatprep.mubr.bf16.mxu0 %v2247_v51 }
  0x7f   : > { %2067 = vmatmul.mubr.bf16.gmra.mxu1 %v2270_v52 }
  0x80   : > { %2070 = vmatprep.mubr.bf16.mxu1 %v2276_v53 }
  0x85   : > { %929 = vmatmul.mubr.bf16.gmra.mxu0 %v2249_v54  ;;  %v301_v54 = vld [vmem:[#allocation2 + $0x28] sm:$0xff] }
  0x86   : > { %936 = vmatprep.mubr.bf16.mxu0 %v2250_v55 }
  0x87   : > { %2071 = vmatmul.mubr.bf16.gmra.mxu1 %v2278_v56 }
  0x8d   : > { %937 = vmatmul.mubr.bf16.gmra.mxu0 %v2252_v57 }
  0x8e   : > { %944 = vmatprep.mubr.bf16.mxu0 %v2255_v58 }
  0x95   : > { %945 = vmatmul.mubr.bf16.gmra.mxu0 %v2257_v60 }
  0x96   : > { %952 = vmatprep.mubr.bf16.mxu0 %v2258_v61  ;;  %v302_v61 = vld [vmem:[#allocation2 + $0x30] sm:$0xff] }
  0x9d   : > { %953 = vmatmul.mubr.bf16.gmra.mxu0 %v2260_v62 }
  0x9e   : > { %960 = vmatprep.mubr.bf16.mxu0 %v2263_v63 }
  0xa5   : > { %961 = vmatmul.mubr.bf16.gmra.mxu0 %v2265_v1 }
  0xa6   : > { %968 = vmatprep.mubr.bf16.mxu0 %v2266_v2 }
  0xad   : > { %969 = vmatmul.mubr.bf16.gmra.mxu0 %v2268_v3 }
  0xae   : > { %976 = vmatprep.mubr.bf16.mxu0 %v2271_v4 }
  0xb5   : > { %977 = vmatmul.mubr.bf16.gmra.mxu0 %v2273_v5  ;;  %v303_v5 = vld [vmem:[#allocation2 + $0x38] sm:$0xff] }
  0xb6   : > { %984 = vmatprep.mubr.bf16.mxu0 %v2274_v6 }
  0xbd   : > { %985 = vmatmul.mubr.bf16.gmra.mxu0 %v2277_v7 }
  0xbe   : > { %992 = vmatprep.mubr.bf16.mxu0 %v2279_v8 }
  0xc5   : > { %993 = vmatmul.mubr.bf16.gmra.mxu0 %v2281_v9 }
 0x10d   : > { %v1873_v10 = vpop.f32.mrf.mxu0 }
 0x10f   : > { %v1874_v11 = vpop.f32.mrf.mxu0  ;;  %v2044_v12 = vpop.f32.mrf.mxu1 }
 0x110   : > { %v1875_v13 = vadd.f32 %v1874_v11, %v1873_v10 }
 0x111   : > { %v1876_v14 = vpop.f32.mrf.mxu0  ;;  %v1035_v16 = vpop.f32.mrf.mxu1 }
 0x112   : > { %v1036_v17 = vadd.f32 %v1875_v13, %v1035_v16 }
 0x113   : > { %v1877_v18 = vpop.f32.mrf.mxu0  ;;  %v2045_v19 = vpop.f32.mrf.mxu1 }
 0x114   : > { %v1162_v20 = vadd.f32 %v1036_v17, %v296_v15  ;;  %v1878_v21 = vadd.f32 %v1877_v18, %v1876_v14  ;;  %v304_v14 = vld [vmem:[#allocation2 + $0x40] sm:$0xff] }
 0x115   : > { %v1879_v22 = vpop.f32.mrf.mxu0  ;;  %v1038_v24 = vpop.f32.mrf.mxu1 }
 0x116   : > { %1195 = vst.msk [vmem:[#allocation2] sm:$0xff] %vm263_vm0, %v1162_v20  ;;  %v1039_v25 = vadd.f32 %v1878_v21, %v1038_v24 }
 0x117   : > { %v1880_v26 = vpop.f32.mrf.mxu0  ;;  %v2048_v27 = vpop.f32.mrf.mxu1 }
 0x118   : > { %v1163_v28 = vadd.f32 %v1039_v25, %v297_v23  ;;  %v1881_v29 = vadd.f32 %v1880_v26, %v1879_v22  ;;  %v305_v22 = vld [vmem:[#allocation2 + $0x48] sm:$0xff] }
 0x119   : > { %v1882_v31 = vpop.f32.mrf.mxu0  ;;  %v1051_v34 = vpop.f32.mrf.mxu1 }
 0x11a   : > { %1196 = vst.msk [vmem:[#allocation2 + $0x8] sm:$0xff] %vm263_vm0, %v1163_v28  ;;  %v1044_v32 = vadd.f32 %v2044_v12, %v1881_v29  ;;  %v306_v29 = vld [vmem:[#allocation2 + $0x50] sm:$0xff] }
 0x11b   : > { %v1883_v33 = vpop.f32.mrf.mxu0  ;;  %v2049_v42 = vpop.f32.mrf.mxu1 }
 0x11c   : > { %v1164_v35 = vadd.f32 %v1044_v32, %v298_v30  ;;  %v1884_v36 = vadd.f32 %v1883_v33, %v1882_v31 }
 0x11d   : > { %v1885_v38 = vpop.f32.mrf.mxu0  ;;  %v1230_v39 = vld [vmem:[#allocation2] sm:$0xff]  ;;  %v1054_v50 = vpop.f32.mrf.mxu1 }
 0x11e   : > { %1197 = vst.msk [vmem:[#allocation2 + $0x10] sm:$0xff] %vm263_vm0, %v1164_v35  ;;  %v1047_v40 = vadd.f32 %v2045_v19, %v1884_v36  ;;  %2076 = vmatprep.mubr.msk.f32.mxu1 %vm263_vm0, %v1230_v39 }
 0x11f   : > { %v1886_v41 = vpop.f32.mrf.mxu0  ;;  %v2052_v58 = vpop.f32.mrf.mxu1 }
 0x120   : > { %v1165_v43 = vadd.f32 %v1047_v40, %v299_v37  ;;  %v1887_v44 = vadd.f32 %v1886_v41, %v1885_v38  ;;  %v307_v37 = vld [vmem:[#allocation2 + $0x58] sm:$0xff] }
 0x121   : > { %v1888_v45 = vpop.f32.mrf.mxu0  ;;  %v1231_v47 = vld [vmem:[#allocation2 + $0x8] sm:$0xff]  ;;  %v1067_v2 = vpop.f32.mrf.mxu1 }
 0x122   : > { %1198 = vst.msk [vmem:[#allocation2 + $0x18] sm:$0xff] %vm263_vm0, %v1165_v43  ;;  %v1052_v48 = vadd.f32 %v1887_v44, %v1051_v34  ;;  %2077 = vmatmul.mubr.msk.f32.vlgmr.msra.gmra.mxu1 %vm263_vm0, %v1231_v47 }
 0x123   : > { %v1889_v49 = vpop.f32.mrf.mxu0  ;;  %v2053_v10 = vpop.f32.mrf.mxu1 }
 0x124   : > { %v1166_v51 = vadd.f32 %v1052_v48, %v300_v46  ;;  %v1890_v52 = vadd.f32 %v1889_v49, %v1888_v45  ;;  %v308_v46 = vld [vmem:[#allocation2 + $0x60] sm:$0xff] }
 0x125   : > { %v1891_v53 = vpop.f32.mrf.mxu0  ;;  %v1232_v55 = vld [vmem:[#allocation2 + $0x10] sm:$0xff]  ;;  %v1070_v18 = vpop.f32.mrf.mxu1 }
 0x126   : > { %1199 = vst.msk [vmem:[#allocation2 + $0x20] sm:$0xff] %vm263_vm0, %v1166_v51  ;;  %v1055_v56 = vadd.f32 %v1890_v52, %v1054_v50  ;;  %2079 = vmatprep.mubr.msk.f32.mxu1 %vm263_vm0, %v1232_v55 }
 0x127   : > { %v1892_v57 = vpop.f32.mrf.mxu0  ;;  %v2056_v26 = vpop.f32.mrf.mxu1 }
 0x128   : > { %v1167_v59 = vadd.f32 %v1055_v56, %v301_v54  ;;  %v1893_v60 = vadd.f32 %v1892_v57, %v1891_v53  ;;  %v309_v54 = vld [vmem:[#allocation2 + $0x68] sm:$0xff] }
 0x129   : > { %v1894_v62 = vpop.f32.mrf.mxu0  ;;  %v1233_v63 = vld [vmem:[#allocation2 + $0x18] sm:$0xff]  ;;  %v1083_v34 = vpop.f32.mrf.mxu1 }
 0x12a   : > { %1200 = vst.msk [vmem:[#allocation2 + $0x28] sm:$0xff] %vm263_vm0, %v1167_v59  ;;  %v1060_v0 = vadd.f32 %v2048_v27, %v1893_v60  ;;  %2080 = vmatmul.mubr.msk.f32.gmra.mxu1 %vm263_vm0, %v1233_v63 }
 0x12b   : > { %v1895_v1 = vpop.f32.mrf.mxu0 }
 0x12c   : > { %v1168_v3 = vadd.f32 %v1060_v0, %v302_v61  ;;  %v1896_v4 = vadd.f32 %v1895_v1, %v1894_v62  ;;  %v310_v61 = vld [vmem:[#allocation2 + $0x70] sm:$0xff] }
 0x12d   : > { %v1897_v6 = vpop.f32.mrf.mxu0  ;;  %v1234_v7 = vld [vmem:[#allocation2 + $0x20] sm:$0xff] }
 0x12e   : > { %1201 = vst.msk [vmem:[#allocation2 + $0x30] sm:$0xff] %vm263_vm0, %v1168_v3  ;;  %v1063_v8 = vadd.f32 %v2049_v42, %v1896_v4  ;;  %2082 = vmatprep.mubr.msk.f32.mxu1 %vm263_vm0, %v1234_v7  ;;  %v2057_v42 = vpop.f32.mrf.mxu1 }
 0x12f   : > { %v1898_v9 = vpop.f32.mrf.mxu0 }
 0x130   : > { %v1169_v11 = vadd.f32 %v1063_v8, %v303_v5  ;;  %v1899_v12 = vadd.f32 %v1898_v9, %v1897_v6  ;;  %v1086_v50 = vpop.f32.mrf.mxu1  ;;  %v311_v5 = vld [vmem:[#allocation2 + $0x78] sm:$0xff] }
 0x131   : > { %v1900_v13 = vpop.f32.mrf.mxu0  ;;  %v1235_v15 = vld [vmem:[#allocation2 + $0x28] sm:$0xff] }
 0x132   : > { %1202 = vst.msk [vmem:[#allocation2 + $0x38] sm:$0xff] %vm263_vm0, %v1169_v11  ;;  %v1068_v16 = vadd.f32 %v1899_v12, %v1067_v2  ;;  %2083 = vmatmul.mubr.msk.f32.gmra.mxu1 %vm263_vm0, %v1235_v15 }
 0x133   : > { %v1901_v17 = vpop.f32.mrf.mxu0 }
 0x134   : > { %v1170_v19 = vadd.f32 %v1068_v16, %v304_v14  ;;  %v1902_v20 = vadd.f32 %v1901_v17, %v1900_v13  ;;  %v312_v14 = vld [vmem:[#allocation2 + $0x80] sm:$0xff] }
 0x135   : > { %v1903_v21 = vpop.f32.mrf.mxu0  ;;  %v1236_v23 = vld [vmem:[#allocation2 + $0x30] sm:$0xff] }
 0x136   : > { %1203 = vst.msk [vmem:[#allocation2 + $0x40] sm:$0xff] %vm263_vm0, %v1170_v19  ;;  %v1071_v24 = vadd.f32 %v1902_v20, %v1070_v18  ;;  %2085 = vmatprep.mubr.msk.f32.mxu1 %vm263_vm0, %v1236_v23 }
 0x137   : > { %v1904_v25 = vpop.f32.mrf.mxu0 }
 0x138   : > { %v1171_v27 = vadd.f32 %v1071_v24, %v305_v22  ;;  %v1905_v28 = vadd.f32 %v1904_v25, %v1903_v21  ;;  %v313_v22 = vld [vmem:[#allocation2 + $0x88] sm:$0xff] }
 0x139   : > { %v1906_v30 = vpop.f32.mrf.mxu0  ;;  %v1237_v31 = vld [vmem:[#allocation2 + $0x38] sm:$0xff] }
 0x13a   : > { %1204 = vst.msk [vmem:[#allocation2 + $0x48] sm:$0xff] %vm263_vm0, %v1171_v27  ;;  %v1076_v32 = vadd.f32 %v2052_v58, %v1905_v28  ;;  %2086 = vmatmul.mubr.msk.f32.gmra.mxu1 %vm263_vm0, %v1237_v31  ;;  %v2060_v58 = vpop.f32.mrf.mxu1 }
 0x13b   : > { %v1907_v33 = vpop.f32.mrf.mxu0 }
 0x13c   : > { %v1172_v35 = vadd.f32 %v1076_v32, %v306_v29  ;;  %v1908_v36 = vadd.f32 %v1907_v33, %v1906_v30  ;;  %v1099_v2 = vpop.f32.mrf.mxu1  ;;  %v314_v29 = vld [vmem:[#allocation2 + $0x90] sm:$0xff] }
 0x13d   : > { %v1909_v38 = vpop.f32.mrf.mxu0  ;;  %v1238_v39 = vld [vmem:[#allocation2 + $0x40] sm:$0xff] }
 0x13e   : > { %1205 = vst.msk [vmem:[#allocation2 + $0x50] sm:$0xff] %vm263_vm0, %v1172_v35  ;;  %v1079_v40 = vadd.f32 %v2053_v10, %v1908_v36  ;;  %2088 = vmatprep.mubr.msk.f32.mxu1 %vm263_vm0, %v1238_v39  ;;  %v2061_v10 = vpop.f32.mrf.mxu1 }
 0x13f   : > { %v1910_v41 = vpop.f32.mrf.mxu0 }
 0x140   : > { %v1173_v43 = vadd.f32 %v1079_v40, %v307_v37  ;;  %v1911_v44 = vadd.f32 %v1910_v41, %v1909_v38  ;;  %v1102_v18 = vpop.f32.mrf.mxu1  ;;  %v315_v37 = vld [vmem:[#allocation2 + $0x98] sm:$0xff] }
 0x141   : > { %v1912_v45 = vpop.f32.mrf.mxu0  ;;  %v1239_v47 = vld [vmem:[#allocation2 + $0x48] sm:$0xff] }
 0x142   : > { %1206 = vst.msk [vmem:[#allocation2 + $0x58] sm:$0xff] %vm263_vm0, %v1173_v43  ;;  %v1084_v48 = vadd.f32 %v1911_v44, %v1083_v34  ;;  %2089 = vmatmul.mubr.msk.f32.gmra.mxu1 %vm263_vm0, %v1239_v47 }
 0x143   : > { %v1913_v49 = vpop.f32.mrf.mxu0 }
 0x144   : > { %v1174_v51 = vadd.f32 %v1084_v48, %v308_v46  ;;  %v1914_v52 = vadd.f32 %v1913_v49, %v1912_v45  ;;  %v316_v46 = vld [vmem:[#allocation2 + $0xa0] sm:$0xff] }
 0x145   : > { %v1915_v53 = vpop.f32.mrf.mxu0  ;;  %v1240_v55 = vld [vmem:[#allocation2 + $0x50] sm:$0xff] }
 0x146   : > { %1207 = vst.msk [vmem:[#allocation2 + $0x60] sm:$0xff] %vm263_vm0, %v1174_v51  ;;  %v1087_v56 = vadd.f32 %v1914_v52, %v1086_v50  ;;  %2091 = vmatprep.mubr.msk.f32.mxu1 %vm263_vm0, %v1240_v55 }
 0x147   : > { %v1916_v57 = vpop.f32.mrf.mxu0 }
 0x148   : > { %v1175_v59 = vadd.f32 %v1087_v56, %v309_v54  ;;  %v1917_v60 = vadd.f32 %v1916_v57, %v1915_v53  ;;  %v317_v54 = vld [vmem:[#allocation2 + $0xa8] sm:$0xff] }
 0x149   : > { %v1918_v62 = vpop.f32.mrf.mxu0  ;;  %v1241_v63 = vld [vmem:[#allocation2 + $0x58] sm:$0xff] }
 0x14a   : > { %1208 = vst.msk [vmem:[#allocation2 + $0x68] sm:$0xff] %vm263_vm0, %v1175_v59  ;;  %v1092_v0 = vadd.f32 %v2056_v26, %v1917_v60  ;;  %2092 = vmatmul.mubr.msk.f32.gmra.mxu1 %vm263_vm0, %v1241_v63  ;;  %v2064_v26 = vpop.f32.mrf.mxu1 }
 0x14b   : > { %v1919_v1 = vpop.f32.mrf.mxu0 }
 0x14c   : > { %v1176_v3 = vadd.f32 %v1092_v0, %v310_v61  ;;  %v1920_v4 = vadd.f32 %v1919_v1, %v1918_v62  ;;  %v1115_v34 = vpop.f32.mrf.mxu1  ;;  %v318_v61 = vld [vmem:[#allocation2 + $0xb0] sm:$0xff] }
 0x14d   : > { %v1921_v6 = vpop.f32.mrf.mxu0  ;;  %v1242_v7 = vld [vmem:[#allocation2 + $0x60] sm:$0xff] }
 0x14e   : > { %1209 = vst.msk [vmem:[#allocation2 + $0x70] sm:$0xff] %vm263_vm0, %v1176_v3  ;;  %v1095_v8 = vadd.f32 %v2057_v42, %v1920_v4  ;;  %2094 = vmatprep.mubr.msk.f32.mxu1 %vm263_vm0, %v1242_v7  ;;  %v2065_v42 = vpop.f32.mrf.mxu1 }
 0x14f   : > { %v1922_v9 = vpop.f32.mrf.mxu0 }
 0x150   : > { %v1177_v11 = vadd.f32 %v1095_v8, %v311_v5  ;;  %v1923_v12 = vadd.f32 %v1922_v9, %v1921_v6  ;;  %v1118_v50 = vpop.f32.mrf.mxu1  ;;  %v319_v5 = vld [vmem:[#allocation2 + $0xb8] sm:$0xff] }
 0x151   : > { %v1924_v13 = vpop.f32.mrf.mxu0  ;;  %v1243_v15 = vld [vmem:[#allocation2 + $0x68] sm:$0xff] }
 0x152   : > { %1210 = vst.msk [vmem:[#allocation2 + $0x78] sm:$0xff] %vm263_vm0, %v1177_v11  ;;  %v1100_v16 = vadd.f32 %v1923_v12, %v1099_v2  ;;  %2095 = vmatmul.mubr.msk.f32.gmra.mxu1 %vm263_vm0, %v1243_v15 }
 0x153   : > { %v1925_v17 = vpop.f32.mrf.mxu0 }
 0x154   : > { %v1178_v19 = vadd.f32 %v1100_v16, %v312_v14  ;;  %v1926_v20 = vadd.f32 %v1925_v17, %v1924_v13  ;;  %v320_v14 = vld [vmem:[#allocation2 + $0xc0] sm:$0xff] }
 0x155   : > { %v1927_v21 = vpop.f32.mrf.mxu0  ;;  %v1244_v23 = vld [vmem:[#allocation2 + $0x70] sm:$0xff] }
 0x156   : > { %1211 = vst.msk [vmem:[#allocation2 + $0x80] sm:$0xff] %vm263_vm0, %v1178_v19  ;;  %v1103_v24 = vadd.f32 %v1926_v20, %v1102_v18  ;;  %2097 = vmatprep.mubr.msk.f32.mxu1 %vm263_vm0, %v1244_v23 }
 0x157   : > { %v1928_v25 = vpop.f32.mrf.mxu0 }
 0x158   : > { %v1179_v27 = vadd.f32 %v1103_v24, %v313_v22  ;;  %v1929_v28 = vadd.f32 %v1928_v25, %v1927_v21  ;;  %v321_v22 = vld [vmem:[#allocation2 + $0xc8] sm:$0xff] }
 0x159   : > { %v1930_v30 = vpop.f32.mrf.mxu0  ;;  %v1245_v31 = vld [vmem:[#allocation2 + $0x78] sm:$0xff] }
 0x15a   : > { %1212 = vst.msk [vmem:[#allocation2 + $0x88] sm:$0xff] %vm263_vm0, %v1179_v27  ;;  %v1108_v32 = vadd.f32 %v2060_v58, %v1929_v28  ;;  %2098 = vmatmul.mubr.msk.f32.gmra.mxu1 %vm263_vm0, %v1245_v31  ;;  %v2068_v58 = vpop.f32.mrf.mxu1  ;;  %v322_v28 = vld [vmem:[#allocation2 + $0xd0] sm:$0xff] }
 0x15b   : > { %v1931_v33 = vpop.f32.mrf.mxu0 }
 0x15c   : > { %v1180_v35 = vadd.f32 %v1108_v32, %v314_v29  ;;  %v1932_v36 = vadd.f32 %v1931_v33, %v1930_v30  ;;  %v1131_v2 = vpop.f32.mrf.mxu1 }
 0x15d   : > { %v1933_v38 = vpop.f32.mrf.mxu0  ;;  %v1246_v39 = vld [vmem:[#allocation2 + $0x80] sm:$0xff] }
 0x15e   : > { %1213 = vst.msk [vmem:[#allocation2 + $0x90] sm:$0xff] %vm263_vm0, %v1180_v35  ;;  %v1111_v40 = vadd.f32 %v2061_v10, %v1932_v36  ;;  %2100 = vmatprep.mubr.msk.f32.mxu1 %vm263_vm0, %v1246_v39  ;;  %v2069_v10 = vpop.f32.mrf.mxu1  ;;  %v323_v36 = vld [vmem:[#allocation2 + $0xd8] sm:$0xff] }
 0x15f   : > { %v1934_v41 = vpop.f32.mrf.mxu0 }
 0x160   : > { %v1181_v43 = vadd.f32 %v1111_v40, %v315_v37  ;;  %v1935_v44 = vadd.f32 %v1934_v41, %v1933_v38  ;;  %v1134_v18 = vpop.f32.mrf.mxu1 }
 0x161   : > { %v1936_v45 = vpop.f32.mrf.mxu0  ;;  %v1247_v47 = vld [vmem:[#allocation2 + $0x88] sm:$0xff] }
 0x162   : > { %1214 = vst.msk [vmem:[#allocation2 + $0x98] sm:$0xff] %vm263_vm0, %v1181_v43  ;;  %v1116_v48 = vadd.f32 %v1935_v44, %v1115_v34  ;;  %2101 = vmatmul.mubr.msk.f32.gmra.mxu1 %vm263_vm0, %v1247_v47  ;;  %v2072_v31 = vpop.f32.mrf.mxu1  ;;  %v324_v44 = vld [vmem:[#allocation2 + $0xe0] sm:$0xff] }
 0x163   : > { %v1937_v49 = vpop.f32.mrf.mxu0 }
 0x164   : > { %v1182_v51 = vadd.f32 %v1116_v48, %v316_v46  ;;  %v1938_v52 = vadd.f32 %v1937_v49, %v1936_v45  ;;  %v1147_v39 = vpop.f32.mrf.mxu1 }
 0x165   : > { %v1939_v53 = vpop.f32.mrf.mxu0  ;;  %v1248_v55 = vld [vmem:[#allocation2 + $0x90] sm:$0xff] }
 0x166   : > { %1215 = vst.msk [vmem:[#allocation2 + $0xa0] sm:$0xff] %vm263_vm0, %v1182_v51  ;;  %v1119_v56 = vadd.f32 %v1938_v52, %v1118_v50  ;;  %2103 = vmatprep.mubr.msk.f32.mxu1 %vm263_vm0, %v1248_v55  ;;  %v2073_v46 = vpop.f32.mrf.mxu1  ;;  %v325_v52 = vld [vmem:[#allocation2 + $0xe8] sm:$0xff] }
 0x167   : > { %v1940_v57 = vpop.f32.mrf.mxu0 }
 0x168   : > { %v1183_v59 = vadd.f32 %v1119_v56, %v317_v54  ;;  %v1941_v60 = vadd.f32 %v1940_v57, %v1939_v53  ;;  %v1150_v53 = vpop.f32.mrf.mxu1 }
 0x169   : > { %v1942_v62 = vpop.f32.mrf.mxu0  ;;  %v1249_v63 = vld [vmem:[#allocation2 + $0x98] sm:$0xff] }
 0x16a   : > { %1216 = vst.msk [vmem:[#allocation2 + $0xa8] sm:$0xff] %vm263_vm0, %v1183_v59  ;;  %v1124_v0 = vadd.f32 %v2064_v26, %v1941_v60  ;;  %2104 = vmatmul.mubr.msk.f32.gmra.mxu1 %vm263_vm0, %v1249_v63  ;;  %v326_v60 = vld [vmem:[#allocation2 + $0xf0] sm:$0xff] }
 0x16b   : > { %v1943_v1 = vpop.f32.mrf.mxu0 }
 0x16c   : > { %v1184_v3 = vadd.f32 %v1124_v0, %v318_v61  ;;  %v1944_v4 = vadd.f32 %v1943_v1, %v1942_v62 }
 0x16d   : > { %v1945_v6 = vpop.f32.mrf.mxu0  ;;  %v1250_v7 = vld [vmem:[#allocation2 + $0xa0] sm:$0xff] }
 0x16e   : > { %1217 = vst.msk [vmem:[#allocation2 + $0xb0] sm:$0xff] %vm263_vm0, %v1184_v3  ;;  %v1127_v8 = vadd.f32 %v2065_v42, %v1944_v4  ;;  %2106 = vmatprep.mubr.msk.f32.mxu1 %vm263_vm0, %v1250_v7  ;;  %v327_v3 = vld [vmem:[#allocation2 + $0xf8] sm:$0xff] }
 0x16f   : > { %v1946_v9 = vpop.f32.mrf.mxu0 }
 0x170   : > { %v1185_v11 = vadd.f32 %v1127_v8, %v319_v5  ;;  %v1947_v12 = vadd.f32 %v1946_v9, %v1945_v6 }
 0x171   : > { %v1948_v13 = vpop.f32.mrf.mxu0  ;;  %v1251_v15 = vld [vmem:[#allocation2 + $0xa8] sm:$0xff] }
 0x172   : > { %1218 = vst.msk [vmem:[#allocation2 + $0xb8] sm:$0xff] %vm263_vm0, %v1185_v11  ;;  %v1132_v16 = vadd.f32 %v1947_v12, %v1131_v2  ;;  %2107 = vmatmul.mubr.msk.f32.gmra.mxu1 %vm263_vm0, %v1251_v15 }
 0x173   : > { %v1949_v17 = vpop.f32.mrf.mxu0 }
 0x174   : > { %v1186_v19 = vadd.f32 %v1132_v16, %v320_v14  ;;  %v1950_v20 = vadd.f32 %v1949_v17, %v1948_v13 }
 0x175   : > { %v1951_v21 = vpop.f32.mrf.mxu0  ;;  %v1252_v23 = vld [vmem:[#allocation2 + $0xb0] sm:$0xff] }
 0x176   : > { %1219 = vst.msk [vmem:[#allocation2 + $0xc0] sm:$0xff] %vm263_vm0, %v1186_v19  ;;  %v1135_v24 = vadd.f32 %v1950_v20, %v1134_v18  ;;  %2109 = vmatprep.mubr.msk.f32.mxu1 %vm263_vm0, %v1252_v23 }
 0x177   : > { %v1952_v25 = vpop.f32.mrf.mxu0 }
 0x178   : > { %v1187_v26 = vadd.f32 %v1135_v24, %v321_v22  ;;  %v1953_v27 = vadd.f32 %v1952_v25, %v1951_v21 }
 0x179   : > { %v1954_v29 = vpop.f32.mrf.mxu0  ;;  %v1253_v30 = vld [vmem:[#allocation2 + $0xb8] sm:$0xff] }
 0x17a   : > { %1220 = vst.msk [vmem:[#allocation2 + $0xc8] sm:$0xff] %vm263_vm0, %v1187_v26  ;;  %v1140_v32 = vadd.f32 %v2068_v58, %v1953_v27  ;;  %2110 = vmatmul.mubr.msk.f32.gmra.mxu1 %vm263_vm0, %v1253_v30 }
 0x17b   : > { %v1955_v33 = vpop.f32.mrf.mxu0 }
 0x17c   : > { %v1188_v34 = vadd.f32 %v1140_v32, %v322_v28  ;;  %v1956_v35 = vadd.f32 %v1955_v33, %v1954_v29 }
 0x17d   : > { %v1957_v37 = vpop.f32.mrf.mxu0  ;;  %v1254_v38 = vld [vmem:[#allocation2 + $0xc0] sm:$0xff] }
 0x17e   : > { %1221 = vst.msk [vmem:[#allocation2 + $0xd0] sm:$0xff] %vm263_vm0, %v1188_v34  ;;  %v1143_v40 = vadd.f32 %v2069_v10, %v1956_v35  ;;  %2112 = vmatprep.mubr.msk.f32.mxu1 %vm263_vm0, %v1254_v38  ;;  %v2741_v10 = vld [vmem:[%s2867_s3] ss:$0 sm:$0xff] }
 0x17f   : > { %v1958_v41 = vpop.f32.mrf.mxu0 }
 0x180   : > { %v1189_v42 = vadd.f32 %v1143_v40, %v323_v36  ;;  %v1959_v43 = vadd.f32 %v1958_v41, %v1957_v37 }
 0x181   : > { %v1960_v45 = vpop.f32.mrf.mxu0  ;;  %v1255_v47 = vld [vmem:[#allocation2 + $0xc8] sm:$0xff] }
 0x182   : > { %1222 = vst.msk [vmem:[#allocation2 + $0xd8] sm:$0xff] %vm263_vm0, %v1189_v42  ;;  %v1148_v48 = vadd.f32 %v1959_v43, %v1147_v39  ;;  %2113 = vmatmul.mubr.msk.f32.gmra.mxu1 %vm263_vm0, %v1255_v47 }
 0x183   : > { %v1961_v49 = vpop.f32.mrf.mxu0 }
 0x184   : > { %v1190_v50 = vadd.f32 %v1148_v48, %v324_v44  ;;  %v1962_v51 = vadd.f32 %v1961_v49, %v1960_v45 }
 0x185   : > { %v1963_v54 = vpop.f32.mrf.mxu0  ;;  %v1256_v55 = vld [vmem:[#allocation2 + $0xd0] sm:$0xff] }
 0x186   : > { %1223 = vst.msk [vmem:[#allocation2 + $0xe0] sm:$0xff] %vm263_vm0, %v1190_v50  ;;  %v1151_v56 = vadd.f32 %v1962_v51, %v1150_v53  ;;  %2115 = vmatprep.mubr.msk.f32.mxu1 %vm263_vm0, %v1256_v55 }
 0x187   : > { %v1964_v57 = vpop.f32.mrf.mxu0 }
 0x188   : > { %v1191_v58 = vadd.f32 %v1151_v56, %v325_v52  ;;  %v1965_v59 = vadd.f32 %v1964_v57, %v1963_v54 }
 0x189   : > { %v1966_v61 = vpop.f32.mrf.mxu0  ;;  %v1257_v62 = vld [vmem:[#allocation2 + $0xd8] sm:$0xff] }
 0x18a   : > { %1224 = vst.msk [vmem:[#allocation2 + $0xe8] sm:$0xff] %vm263_vm0, %v1191_v58  ;;  %v1156_v63 = vadd.f32 %v2072_v31, %v1965_v59  ;;  %2116 = vmatmul.mubr.msk.f32.gmra.mxu1 %vm263_vm0, %v1257_v62 }
 0x18b   : > { %v1967_v0 = vpop.f32.mrf.mxu0 }
 0x18c   : > { %v1192_v1 = vadd.f32 %v1156_v63, %v326_v60  ;;  %v1968_v2 = vadd.f32 %v1967_v0, %v1966_v61 }
 0x18d   : > { %v1258_v4 = vld [vmem:[#allocation2 + $0xe0] sm:$0xff] }
 0x18e   : > { %1225 = vst.msk [vmem:[#allocation2 + $0xf0] sm:$0xff] %vm263_vm0, %v1192_v1  ;;  %v1159_v5 = vadd.f32 %v2073_v46, %v1968_v2  ;;  %2118 = vmatprep.mubr.msk.f32.mxu1 %vm263_vm0, %v1258_v4 }
 0x190   : > { %v1193_v6 = vadd.f32 %v1159_v5, %v327_v3 }
 0x191   : > { %v1259_v7 = vld [vmem:[#allocation2 + $0xe8] sm:$0xff] }
 0x192   : > { %1226 = vst.msk [vmem:[#allocation2 + $0xf8] sm:$0xff] %vm263_vm0, %v1193_v6  ;;  %2119 = vmatmul.mubr.msk.f32.gmra.mxu1 %vm263_vm0, %v1259_v7 }
 0x195   : > { %v1260_v8 = vld [vmem:[#allocation2 + $0xf0] sm:$0xff] }
 0x196   : > { %2121 = vmatprep.mubr.msk.f32.mxu1 %vm263_vm0, %v1260_v8 }
 0x199   : > { %v1261_v9 = vld [vmem:[#allocation2 + $0xf8] sm:$0xff] }
 0x19a   : > { %2122 = vmatmul.mubr.msk.f32.gmra.mxu1 %vm263_vm0, %v1261_v9 }
 0x1e2   : > { %v2078_v11 = vpop.f32.mrf.mxu1 }
 0x1e3   : > { %v1438_v12 = vadd.f32 %v2078_v11, %v2741_v10 }
 0x1e4   : > { %v1432_v13 = vpop.f32.mrf.mxu1 }
 0x1e5   : > { %1592 = vst [vmem:[%s2744_s26 + $0x8] sm:$0xff] %v1438_v12  ;;  %v1433_v14 = vadd.f32 %v2741_v10, %v1432_v13 }
 0x1e7   : > { %1591 = vst [vmem:[%s2744_s26] sm:$0xff] %v1433_v14 }
 0x1ea   : > { %v2081_v15 = vpop.f32.mrf.mxu1 }
 0x1eb   : > { %v1448_v16 = vadd.f32 %v2081_v15, %v2741_v10 }
 0x1ec   : > { %v1442_v17 = vpop.f32.mrf.mxu1 }
 0x1ed   : > { %1594 = vst [vmem:[%s2744_s26 + $0x18] sm:$0xff] %v1448_v16  ;;  %v1443_v18 = vadd.f32 %v2741_v10, %v1442_v17 }
 0x1ef   : > { %1593 = vst [vmem:[%s2744_s26 + $0x10] sm:$0xff] %v1443_v18 }
 0x1f2   : > { %v2084_v19 = vpop.f32.mrf.mxu1 }
 0x1f3   : > { %v1458_v20 = vadd.f32 %v2084_v19, %v2741_v10 }
 0x1f4   : > { %v1452_v21 = vpop.f32.mrf.mxu1 }
 0x1f5   : > { %1596 = vst [vmem:[%s2744_s26 + $0x28] sm:$0xff] %v1458_v20  ;;  %v1453_v22 = vadd.f32 %v2741_v10, %v1452_v21 }
 0x1f7   : > { %1595 = vst [vmem:[%s2744_s26 + $0x20] sm:$0xff] %v1453_v22 }
 0x1fa   : > { %v2087_v23 = vpop.f32.mrf.mxu1 }
 0x1fb   : > { %v1468_v24 = vadd.f32 %v2087_v23, %v2741_v10 }
 0x1fc   : > { %v1462_v25 = vpop.f32.mrf.mxu1 }
 0x1fd   : > { %1598 = vst [vmem:[%s2744_s26 + $0x38] sm:$0xff] %v1468_v24  ;;  %v1463_v26 = vadd.f32 %v2741_v10, %v1462_v25 }
 0x1ff   : > { %1597 = vst [vmem:[%s2744_s26 + $0x30] sm:$0xff] %v1463_v26 }
 0x202   : > { %v2090_v27 = vpop.f32.mrf.mxu1 }
 0x203   : > { %v1478_v28 = vadd.f32 %v2090_v27, %v2741_v10 }
 0x204   : > { %v1472_v29 = vpop.f32.mrf.mxu1 }
 0x205   : > { %1600 = vst [vmem:[%s2744_s26 + $0x48] sm:$0xff] %v1478_v28  ;;  %v1473_v30 = vadd.f32 %v2741_v10, %v1472_v29 }
 0x207   : > { %1599 = vst [vmem:[%s2744_s26 + $0x40] sm:$0xff] %v1473_v30 }
 0x20a   : > { %v2093_v31 = vpop.f32.mrf.mxu1 }
 0x20b   : > { %v1488_v32 = vadd.f32 %v2093_v31, %v2741_v10 }
 0x20c   : > { %v1482_v33 = vpop.f32.mrf.mxu1 }
 0x20d   : > { %1602 = vst [vmem:[%s2744_s26 + $0x58] sm:$0xff] %v1488_v32  ;;  %v1483_v34 = vadd.f32 %v2741_v10, %v1482_v33 }
 0x20f   : > { %1601 = vst [vmem:[%s2744_s26 + $0x50] sm:$0xff] %v1483_v34 }
 0x212   : > { %v2096_v35 = vpop.f32.mrf.mxu1 }
 0x213   : > { %v1498_v36 = vadd.f32 %v2096_v35, %v2741_v10 }
 0x214   : > { %v1492_v37 = vpop.f32.mrf.mxu1 }
 0x215   : > { %1604 = vst [vmem:[%s2744_s26 + $0x68] sm:$0xff] %v1498_v36  ;;  %v1493_v38 = vadd.f32 %v2741_v10, %v1492_v37 }
 0x217   : > { %1603 = vst [vmem:[%s2744_s26 + $0x60] sm:$0xff] %v1493_v38 }
 0x21a   : > { %v2099_v39 = vpop.f32.mrf.mxu1 }
 0x21b   : > { %v1508_v40 = vadd.f32 %v2099_v39, %v2741_v10 }
 0x21c   : > { %v1502_v41 = vpop.f32.mrf.mxu1 }
 0x21d   : > { %1606 = vst [vmem:[%s2744_s26 + $0x78] sm:$0xff] %v1508_v40  ;;  %v1503_v42 = vadd.f32 %v2741_v10, %v1502_v41 }
 0x21f   : > { %1605 = vst [vmem:[%s2744_s26 + $0x70] sm:$0xff] %v1503_v42 }
 0x222   : > { %v2102_v43 = vpop.f32.mrf.mxu1 }
 0x223   : > { %v1518_v44 = vadd.f32 %v2102_v43, %v2741_v10 }
 0x224   : > { %v1512_v45 = vpop.f32.mrf.mxu1 }
 0x225   : > { %1608 = vst [vmem:[%s2744_s26 + $0x88] sm:$0xff] %v1518_v44  ;;  %v1513_v46 = vadd.f32 %v2741_v10, %v1512_v45 }
 0x227   : > { %1607 = vst [vmem:[%s2744_s26 + $0x80] sm:$0xff] %v1513_v46 }
 0x22a   : > { %v2105_v47 = vpop.f32.mrf.mxu1 }
 0x22b   : > { %v1528_v48 = vadd.f32 %v2105_v47, %v2741_v10 }
 0x22c   : > { %v1522_v49 = vpop.f32.mrf.mxu1 }
 0x22d   : > { %1610 = vst [vmem:[%s2744_s26 + $0x98] sm:$0xff] %v1528_v48  ;;  %v1523_v50 = vadd.f32 %v2741_v10, %v1522_v49 }
 0x22f   : > { %1609 = vst [vmem:[%s2744_s26 + $0x90] sm:$0xff] %v1523_v50 }
 0x232   : > { %v2108_v51 = vpop.f32.mrf.mxu1 }
 0x233   : > { %v1538_v52 = vadd.f32 %v2108_v51, %v2741_v10 }
 0x234   : > { %v1532_v53 = vpop.f32.mrf.mxu1 }
 0x235   : > { %1612 = vst [vmem:[%s2744_s26 + $0xa8] sm:$0xff] %v1538_v52  ;;  %v1533_v54 = vadd.f32 %v2741_v10, %v1532_v53 }
 0x237   : > { %1611 = vst [vmem:[%s2744_s26 + $0xa0] sm:$0xff] %v1533_v54 }
 0x23a   : > { %v2111_v55 = vpop.f32.mrf.mxu1 }
 0x23b   : > { %v1548_v56 = vadd.f32 %v2111_v55, %v2741_v10 }
 0x23c   : > { %v1542_v57 = vpop.f32.mrf.mxu1 }
 0x23d   : > { %1614 = vst [vmem:[%s2744_s26 + $0xb8] sm:$0xff] %v1548_v56  ;;  %v1543_v58 = vadd.f32 %v2741_v10, %v1542_v57 }
 0x23f   : > { %1613 = vst [vmem:[%s2744_s26 + $0xb0] sm:$0xff] %v1543_v58 }
 0x242   : > { %v2114_v59 = vpop.f32.mrf.mxu1 }
 0x243   : > { %v1558_v60 = vadd.f32 %v2114_v59, %v2741_v10 }
 0x244   : > { %v1552_v61 = vpop.f32.mrf.mxu1 }
 0x245   : > { %1616 = vst [vmem:[%s2744_s26 + $0xc8] sm:$0xff] %v1558_v60  ;;  %v1553_v62 = vadd.f32 %v2741_v10, %v1552_v61 }
 0x247   : > { %1615 = vst [vmem:[%s2744_s26 + $0xc0] sm:$0xff] %v1553_v62 }
 0x24a   : > { %v2117_v63 = vpop.f32.mrf.mxu1 }
 0x24b   : > { %v1568_v0 = vadd.f32 %v2117_v63, %v2741_v10 }
 0x24c   : > { %v1562_v1 = vpop.f32.mrf.mxu1 }
 0x24d   : > { %1618 = vst [vmem:[%s2744_s26 + $0xd8] sm:$0xff] %v1568_v0  ;;  %v1563_v2 = vadd.f32 %v2741_v10, %v1562_v1 }
 0x24f   : > { %1617 = vst [vmem:[%s2744_s26 + $0xd0] sm:$0xff] %v1563_v2 }
 0x252   : > { %v2120_v3 = vpop.f32.mrf.mxu1 }
 0x253   : > { %v1578_v4 = vadd.f32 %v2120_v3, %v2741_v10 }
 0x254   : > { %v1572_v5 = vpop.f32.mrf.mxu1 }
 0x255   : > { %1620 = vst [vmem:[%s2744_s26 + $0xe8] sm:$0xff] %v1578_v4  ;;  %v1573_v6 = vadd.f32 %v2741_v10, %v1572_v5 }
 0x257   : > { %1619 = vst [vmem:[%s2744_s26 + $0xe0] sm:$0xff] %v1573_v6 }
 0x25a   : > { %v2123_v7 = vpop.f32.mrf.mxu1 }
 0x25b   : > { %v1588_v8 = vadd.f32 %v2123_v7, %v2741_v10 }
 0x25c   : > { %v1582_v9 = vpop.f32.mrf.mxu1 }
 0x25d   : > { %1622 = vst [vmem:[%s2744_s26 + $0xf8] sm:$0xff] %v1588_v8  ;;  %v1583_v11 = vadd.f32 %v2741_v10, %v1582_v9 }
 0x25f   : > { %1621 = vst [vmem:[%s2744_s26 + $0xf0] sm:$0xff] %v1583_v11 }
 0x260   : > { %2323 = shalt.err (!%p2320_p6)
}
 0x261   : > { %s2324_s22 = scalar_lea.hbm %s2811_s11, 4096  ;;  %s2328_s27 = scalar_lea.hbm %s2868_s4, 8192 }
 0x262   : > { %p2325_p4 = scmp.ne.s32.totalorder %s2811_s11, %s2324_s22  ;;  %p2329_p13 = scmp.lt.s32.totalorder %s2811_s11, %s2868_s4 }
 0x263   : > { %p2330_p2 = scmp.lt.s32.totalorder %s2328_s27, %s2324_s22 }
 0x264   : > { %p2326_p7 = pnand %p2325_p4, %p2475_p9 }
 0x265   : > { %p2331_p8 = por %p2330_p2, %p2329_p13 }
 0x266   : > { %p2327_p10 = pneg %p2326_p7 }
 0x268   : > { %p2332_p12 = pnand %p2331_p8, %p2327_p10 }
 0x26a   : > { %2335 = shalt.err (!%p2332_p12)
}
 0x26b   : > { %s2397_s5 = smov 128   ;;  %s2398_s9 = smov 8  }
 0x26c   : > { %2129 = dma.vmem_to_hbm [thread:$0]  (%p2475_p9), %s2813_s7, 4096, %s2811_s11, %s1624_s18, %s2397_s5, %s2397_s5, %s2398_s9  }
 0x26d PF: > { %s1652_s8 = sand.u32 1, %s2370_s15   ;;  %p2874_p0 = scmp.ge.s32.totalorder %s2390_s20, 2 }
 0x26e   : > { %s1653_s12 = scalar_lea.sflag [#allocation5], %s1652_s8 }
 0x26f   : > { %p2136_p1 = pnand %p2874_p0, %p2482_p11 }
 0x271   : > { %p2137_p3 = pneg %p2136_p1 }
 0x273   : > { %2365 = dma.done.wait (%p2137_p3), %s1653_s12, 4096  }
 0x274   : > { %2367 = vsyncadd (%p2137_p3), %s1653_s12, 4294963200  ;;  %s20_s20 = sadd.s32 1, %s2390_s20   ;;  %s2875_s15 = smov %s2374_s16 }
 0x275   : > { %p17_p5 = scmp.ge.s32.totalorder %s20_s20, 4   ;;  %s2876_s16 = smov %s2378_s17 }
 0x276   : > { %s2877_s17 = smov %s2480_s29  ;;  %s2878_s18 = smov %s2386_s19 }
 0x277   : > { %s2879_s19 = smov %s2881_s23  ;;  %19 = sbr.rel (!%p17_p5) target bundleno = 6 (0x6), region = 92 }
 0x27c   :  { %1658 = vsyncpa [#allocation4], 1 }
 0x27d   :  { %1660 = vsyncpa [#allocation4 + $0x1], 1 }
 0x27e   :  { %1661 = vsyncpa [#allocation5], 1 }
 0x27f   :  { %1663 = vsyncpa [#allocation5 + $0x1], 1 }

</bundles_post_ra>
